<compile_context>
chip_gen: v7x
topology: tpu7x:2x2x1
jax: 0.10.0
libtpu: 0.0.40
codegen_flags: <defaults>
</compile_context>

<pallas_src>
import jax
import jax.numpy as jnp
from jax.experimental import pallas as pl
from jax.experimental.pallas import tpu as pltpu

OUT_DIM = 32          # final Linear(64, 32) width, fixed by the module
_SUB = 8              # sublane tile: padded batch rows / row-dim rounding
_BIAS_ROW = 0         # aux row 0: fused conv bias (256 lanes)
_HEAD_BIAS_ROW = 1    # aux row 1: folded head bias (first 128 lanes used)
_TW_OFF = 8           # aux rows [_TW_OFF : _TW_OFF + T_pad): shared pool/mean weights


def _round_up(x, m):
    return (x + m - 1) // m * m


def cnn_encoder_kernel(x_ref, wc_ref, wh_ref, aux_ref, sel_ref, out_ref):
    B = out_ref.shape[0]          # padded batch rows (8)
    BT = x_ref.shape[0]           # B * T_pad im2col rows
    T = BT // B                   # padded conv positions per batch (multiple of 8)
    F = wc_ref.shape[1] // 2      # 256 fused conv channels (128|64|64)
    H = out_ref.shape[1]          # 128 padded head width

    # (1) Conv1d, all 3 branches, all taps, AND both members of every MaxPool pair in
    #     ONE bf16 MXU matmul: columns [0:F) = conv at position t, [F:2F) = conv at t+1.
    y = jnp.dot(x_ref[...], wc_ref[...], preferred_element_type=jnp.float32)   # (BT, 2F)

    # (2) MaxPool1d(2,2) pair-max (lane-aligned slice, no row shift/copy), then
    #     bias + ReLU once:  max(relu(a+b), relu(c+b)) == relu(max(a,c) + b).
    pm = jnp.maximum(y[:, :F], y[:, F:])                                        # (BT, F)
    pm = jnp.maximum(pm + aux_ref[_BIAS_ROW:_BIAS_ROW + 1, :], 0.0)

    # (3) Per-branch masked mean over pooled time: one shared (T, F) weight slab
    #     (even-position pick, valid-pair mask, 1/P divisor) replicated across batch
    #     in VMEM only, then a per-batch row-sum as a small precomputed sel matmul.
    tw = aux_ref[_TW_OFF:_TW_OFF + T, :]                                        # (T, F)
    weighted = pm * jnp.concatenate([tw] * B, axis=0)                           # (BT, F)
    f = jnp.dot(sel_ref[...], weighted, preferred_element_type=jnp.float32)     # (B, F)

    # (4) Head: Linear(256,128)->Linear(128,64)->Linear(64,32) has no activations, so
    #     it was folded offline into ONE affine map (256, 32), zero-padded to 128 lanes.
    h = jnp.dot(f.astype(jnp.bfloat16), wh_ref[...],
                preferred_element_type=jnp.float32)                             # (B, H)
    out_ref[...] = h + aux_ref[_HEAD_BIAS_ROW:_HEAD_BIAS_ROW + 1, :H]


def pack_params(p, seq_len, batch):
    """One-time packing of the module parameters into kernel-friendly arrays.
    NOTE: the packing bakes in seq_len and an upper bound on batch (<= 8 here);
    cnn_encoder_forward asserts the shapes match before launching."""
    w1, w2, w3 = p["w1"], p["w2"], p["w3"]            # (K_j, C_in, C_out)
    K1, D, O1 = w1.shape
    O2, O3 = w2.shape[2], w3.shape[2]
    F = O1 + O2 + O3                                  # 256
    NT = K1 + 1                                       # im2col taps per row (+1 for the pair partner)

    # MaxPool1d(2,2) pair counts per branch (trailing odd element dropped)
    Ps = [(seq_len - w.shape[0] + 1) // 2 for w in (w1, w2, w3)]
    T_pad = _round_up(2 * max(Ps), _SUB)
    B_pad = _round_up(max(batch, 1), _SUB)
    BT = B_pad * T_pad
    assert T_pad % 2 == 0 and T_pad >= 2 * max(Ps)

    # --- fused conv weight: [even-position | odd-position] halves -------------------
    def place(w, shift):  # put branch taps at block rows [shift, shift+K), zero elsewhere
        return jnp.pad(w, ((shift, NT - shift - w.shape[0]), (0, 0), (0, 0)))

    w_even = jnp.concatenate([place(w, 0) for w in (w1, w2, w3)], axis=2)   # (NT, D, F)
    w_odd = jnp.concatenate([place(w, 1) for w in (w1, w2, w3)], axis=2)    # (NT, D, F)
    w_conv = jnp.concatenate([w_even, w_odd], axis=2)
    w_conv = w_conv.reshape(NT * D, 2 * F).astype(jnp.bfloat16)             # (NT*D, 2F)

    # --- shared pool/mean weights (T_pad, F): NOT tiled per batch --------------------
    t = jnp.arange(T_pad)

    def time_w(P, width):
        col = jnp.where((t % 2 == 0) & (t // 2 < P), 1.0 / P, 0.0).astype(jnp.float32)
        return jnp.tile(col[:, None], (1, width))

    tw = jnp.concatenate([time_w(Ps[0], O1), time_w(Ps[1], O2), time_w(Ps[2], O3)],
                         axis=1)                                            # (T_pad, F)

    # --- folded head: 3 activation-free Linears == one affine map (f32, HIGHEST) ----
    HI = jax.lax.Precision.HIGHEST
    wh = jnp.dot(jnp.dot(p["lw1"], p["lw2"], precision=HI), p["lw3"], precision=HI)
    bh = jnp.dot(jnp.dot(p["lb1"], p["lw2"], precision=HI) + p["lb2"], p["lw3"],
                 precision=HI) + p["lb3"]                                   # (1, 32)
    H = p["lw1"].shape[1]                                                   # 128 lanes
    w_head = jnp.pad(wh, ((0, 0), (0, H - wh.shape[1]))).astype(jnp.bfloat16)  # (256, 128)

    # --- aux slab: conv bias | folded head bias | pad | shared tw --------------------
    conv_bias = jnp.concatenate([p["b1"], p["b2"], p["b3"]], axis=1)        # (1, F)
    head_bias = jnp.pad(bh, ((0, 0), (0, F - bh.shape[1])))                 # (1, F)
    aux = jnp.concatenate(
        [conv_bias, head_bias, jnp.zeros((_TW_OFF - 2, F), jnp.float32), tw], axis=0)

    # --- precomputed per-batch row-sum selector --------------------------------------
    sel = (jnp.arange(BT)[None, :] // T_pad
           == jnp.arange(B_pad)[:, None]).astype(jnp.float32)               # (B_pad, BT)

    return {"embedding": p["embedding"], "w_conv": w_conv, "w_head": w_head,
            "aux": aux, "sel": sel}


@jax.jit
def cnn_encoder_forward(tokens, pk):
    # Glue (gather + torch-.view layout + im2col + padding) stays here, fused by jit;
    # all FLOPs run inside the single Pallas kernel below.
    B, L = tokens.shape
    D = pk["embedding"].shape[1]
    NT = pk["w_conv"].shape[0] // D
    K1 = NT - 1
    T_pad = pk["aux"].shape[0] - _TW_OFF
    B_pad, BT = pk["sel"].shape
    H = pk["w_head"].shape[1]

    # packed params bake in (seq_len, batch<=B_pad): fail loudly on mismatch
    assert BT == B_pad * T_pad, "inconsistent packed params"
    assert B <= B_pad, f"batch {B} > packed batch capacity {B_pad}"
    assert T_pad == _round_up(2 * ((L - K1 + 3) // 2), _SUB), \
        "packed params were built for a different seq_len"

    emb = pk["embedding"][tokens]                       # (B, L, D) gather
    # torch `.view(B, voc_dim, L)` is a raw reshape; then channels-last for the matmul
    x = jnp.transpose(emb.reshape(B, D, L), (0, 2, 1))  # (B, L, D)
    # pad batch to B_pad rows and time so every im2col row has NT taps; padded
    # positions only ever feed zero-weighted rows of tw.
    x = jnp.pad(x, ((0, B_pad - B), (0, T_pad + K1 - L), (0, 0)))
    cols = jnp.concatenate([x[:, k:k + T_pad, :] for k in range(NT)], axis=2)
    x_cols = cols.reshape(BT, NT * D).astype(jnp.bfloat16)                 # (BT, NT*D)

    vmem = pl.BlockSpec(memory_space=pltpu.MemorySpace.VMEM)
    out = pl.pallas_call(
        cnn_encoder_kernel,
        out_shape=jax.ShapeDtypeStruct((B_pad, H), jnp.float32),
        in_specs=[vmem] * 5,
        out_specs=vmem,
    )(x_cols, pk["w_conv"], pk["w_head"], pk["aux"], pk["sel"])
    return out[:B, :OUT_DIM]


def reference_forward(tokens, p):
    emb = p["embedding"][tokens]
    B, L, D = emb.shape
    x = jnp.transpose(emb.reshape(B, D, L), (0, 2, 1))  # (B, T=L, C=D)
    HI = jax.lax.Precision.HIGHEST

    def branch(w, b):
        K, _, O = w.shape
        T_out = L - K + 1
        y = sum(jnp.einsum("btc,co->bto", x[:, k:k + T_out, :], w[k], precision=HI)
                for k in range(K)) + b[None, :, :]
        y = jnp.maximum(y, 0.0)
        P = T_out // 2
        y = y[:, :2 * P, :].reshape(B, P, 2, O).max(axis=2)
        return y.mean(axis=1)

    f = jnp.concatenate([branch(p["w1"], p["b1"]),
                         branch(p["w2"], p["b2"]),
                         branch(p["w3"], p["b3"])], axis=1)
    h = jnp.dot(f, p["lw1"], precision=HI) + p["lb1"]
    h = jnp.dot(h, p["lw2"], precision=HI) + p["lb2"]
    h = jnp.dot(h, p["lw3"], precision=HI) + p["lb3"]
    return h


def init_params(key, voc_size, voc_dim, kernel_size):
    ks = jax.random.split(key, 16)
    n = lambda k, shape, s: (jax.random.normal(k, shape, jnp.float32) * s)
    return {
        "embedding": n(ks[0], (voc_size, voc_dim), 1.0),
        "w1": n(ks[1], (kernel_size + 1, voc_dim, 128), 0.1), "b1": n(ks[2], (1, 128), 0.1),
        "w2": n(ks[3], (kernel_size,     voc_dim, 64),  0.1), "b2": n(ks[4], (1, 64),  0.1),
        "w3": n(ks[5], (kernel_size - 1, voc_dim, 64),  0.1), "b3": n(ks[6], (1, 64),  0.1),
        "lw1": n(ks[7], (256, 128), 0.05), "lb1": n(ks[8],  (1, 128), 0.05),
        "lw2": n(ks[9], (128, 64),  0.05), "lb2": n(ks[10], (1, 64),  0.05),
        "lw3": n(ks[11], (64, 32),  0.05), "lb3": n(ks[12], (1, 32),  0.05),
    }


if __name__ == "__main__":
    voc_size, voc_dim, kernel_size = 37, 16, 3
    B, L = 2, 24

    key = jax.random.PRNGKey(0)
    k_par, k_tok = jax.random.split(key)
    params = init_params(k_par, voc_size, voc_dim, kernel_size)
    tokens = jax.random.randint(k_tok, (B, L), 0, voc_size, dtype=jnp.int32)

    packed = pack_params(params, L, B)                     # one-time weight packing
    out = cnn_encoder_forward(tokens, packed)
    out = jax.block_until_ready(out)
    assert out.shape == (B, OUT_DIM) and out.dtype == jnp.float32

    ref = jax.block_until_ready(reference_forward(tokens, params))
    assert jnp.allclose(out, ref, atol=1e-2, rtol=1e-2), (out, ref)

    print("KERNEL_OK")
</pallas_src>

<mosaic_0001>
module attributes {stable_mosaic.version = 11 : i64} {
  func.func @cnn_encoder_kernel(%arg0: memref<192x80xbf16, #tpu.memory_space<vmem>>, %arg1: memref<80x512xbf16, #tpu.memory_space<vmem>>, %arg2: memref<256x128xbf16, #tpu.memory_space<vmem>>, %arg3: memref<32x256xf32, #tpu.memory_space<vmem>>, %arg4: memref<8x192xf32, #tpu.memory_space<vmem>>, %arg5: memref<8x128xf32, #tpu.memory_space<vmem>>) attributes {dimension_semantics = [], scalar_prefetch = 0 : i64, scratch_operands = 0 : i64, tpu.core_type = #tpu.core_type<tc>} {
    %c0 = arith.constant 0 : index
    %c0_0 = arith.constant 0 : index
    %0 = vector.load %arg0[%c0, %c0_0] : memref<192x80xbf16, #tpu.memory_space<vmem>>, vector<192x80xbf16>
    %c0_1 = arith.constant 0 : index
    %c0_2 = arith.constant 0 : index
    %1 = vector.load %arg1[%c0_1, %c0_2] : memref<80x512xbf16, #tpu.memory_space<vmem>>, vector<80x512xbf16>
    %cst = arith.constant dense<0.000000e+00> : vector<192x512xf32>
    %2 = tpu.matmul %0, %1, %cst {dimension_numbers = #tpu.dot_dimension_numbers<[1], [0], [0], [1], [0, 0, 1, 1], [], []>} : vector<192x80xbf16>, vector<80x512xbf16>, vector<192x512xf32> -> vector<192x512xf32>
    %3 = vector.extract_strided_slice %2 {offsets = [0, 0], sizes = [192, 256], strides = [1, 1]} : vector<192x512xf32> to vector<192x256xf32>
    %4 = vector.extract_strided_slice %2 {offsets = [0, 256], sizes = [192, 256], strides = [1, 1]} : vector<192x512xf32> to vector<192x256xf32>
    %5 = arith.maximumf %3, %4 : vector<192x256xf32>
    %c0_3 = arith.constant 0 : index
    %c0_4 = arith.constant 0 : index
    %6 = vector.load %arg3[%c0_3, %c0_4] : memref<32x256xf32, #tpu.memory_space<vmem>>, vector<1x256xf32>
    %7 = vector.broadcast %6 : vector<1x256xf32> to vector<192x256xf32>
    %8 = arith.addf %5, %7 : vector<192x256xf32>
    %cst_5 = arith.constant 0.000000e+00 : f32
    %9 = vector.broadcast %cst_5 : f32 to vector<192x256xf32>
    %10 = arith.maximumf %8, %9 : vector<192x256xf32>
    %c8 = arith.constant 8 : index
    %c0_6 = arith.constant 0 : index
    %11 = vector.load %arg3[%c8, %c0_6] : memref<32x256xf32, #tpu.memory_space<vmem>>, vector<24x256xf32>
    %12 = tpu.concatenate %11, %11, %11, %11, %11, %11, %11, %11 in 0 : vector<24x256xf32>, vector<24x256xf32>, vector<24x256xf32>, vector<24x256xf32>, vector<24x256xf32>, vector<24x256xf32>, vector<24x256xf32>, vector<24x256xf32> -> vector<192x256xf32>
    %13 = arith.mulf %10, %12 : vector<192x256xf32>
    %c0_7 = arith.constant 0 : index
    %c0_8 = arith.constant 0 : index
    %14 = vector.load %arg4[%c0_7, %c0_8] : memref<8x192xf32, #tpu.memory_space<vmem>>, vector<8x192xf32>
    %cst_9 = arith.constant dense<0.000000e+00> : vector<8x256xf32>
    %15 = tpu.matmul %14, %13, %cst_9 {dimension_numbers = #tpu.dot_dimension_numbers<[1], [0], [0], [1], [0, 0, 1, 1], [], []>} : vector<8x192xf32>, vector<192x256xf32>, vector<8x256xf32> -> vector<8x256xf32>
    %16 = arith.truncf %15 : vector<8x256xf32> to vector<8x256xbf16>
    %c0_10 = arith.constant 0 : index
    %c0_11 = arith.constant 0 : index
    %17 = vector.load %arg2[%c0_10, %c0_11] : memref<256x128xbf16, #tpu.memory_space<vmem>>, vector<256x128xbf16>
    %cst_12 = arith.constant dense<0.000000e+00> : vector<8x128xf32>
    %18 = tpu.matmul %16, %17, %cst_12 {dimension_numbers = #tpu.dot_dimension_numbers<[1], [0], [0], [1], [0, 0, 1, 1], [], []>} : vector<8x256xbf16>, vector<256x128xbf16>, vector<8x128xf32> -> vector<8x128xf32>
    %c1 = arith.constant 1 : index
    %c0_13 = arith.constant 0 : index
    %19 = vector.load %arg3[%c1, %c0_13] : memref<32x256xf32, #tpu.memory_space<vmem>>, vector<1x128xf32>
    %20 = vector.broadcast %19 : vector<1x128xf32> to vector<8x128xf32>
    %21 = arith.addf %18, %20 : vector<8x128xf32>
    %c0_14 = arith.constant 0 : index
    %c0_15 = arith.constant 0 : index
    %22 = vector.load %arg5[%c0_14, %c0_15] : memref<8x128xf32, #tpu.memory_space<vmem>>, vector<8x128xf32>
    tpu.vector_store %arg5[%c0_14, %c0_15], %21 {strides = array<i32>} : memref<8x128xf32, #tpu.memory_space<vmem>>, vector<8x128xf32>,
    return
  }
}

</mosaic_0001>

<bundles_post_ra>
// kernel: cnn_encoder_forward.1
= control target key start
LH: loop header
LB: loop body
LE: loop exit
PB: predicated region body
PF: predicated region fallthrough
CT: control target
= control target key end

     0   :  { %v1233_v1 = vmov 0   ;;  %vm225_vm0 = vcmask 654336   ;;  %vm780_vm1 = vcmask 523264   ;;  %v618_v40 = vlaneseq  ;;  %s1601_s1 = inlined_call_operand.vmem [shape: bf16[80,512], index: 1, kind: input, shape index: {}]   ;;  %s1602_s0 = inlined_call_operand.vmem [shape: bf16[192,80], index: 0, kind: input, shape index: {}]   ;;  %s1603_s4 = inlined_call_operand.vmem [shape: f32[8,192], index: 4, kind: input, shape index: {}]   ;;  %s1604_s2 = inlined_call_operand.vmem [shape: bf16[256,128], index: 2, kind: input, shape index: {}]   ;;  %s1605_s3 = inlined_call_operand.vmem [shape: f32[32,256], index: 3, kind: input, shape index: {}]   ;;  %s1606_s5 = inlined_call_operand.vmem [shape: f32[8,128], index: 5, kind: output, shape index: {}]  }
   0x1   :  { %v1175_v0 = vld [vmem:[%s1601_s1 + $0x4] ss:$16 sps:$4 sm:$0xff]   ;;  %294 = vmatprep.mubr.bf16.mxu0 %v1233_v1  ;;  %447 = vmatprep.mubr.bf16.mxu1 %v1233_v1  ;;  %v1177_v2 = vld [vmem:[%s1601_s1 + $0xc] ss:$16 sps:$4 sm:$0xff]   ;;  %v1179_v3 = vld [vmem:[%s1601_s1] ss:$16 sps:$4 sm:$0xff]  }
   0x2   :  { %262 = vmatprep.subr.bf16.mxu0 %v1175_v0  ;;  %v1180_v4 = vld [vmem:[%s1601_s1 + $0x8] ss:$16 sps:$4 sm:$0xff]   ;;  %415 = vmatprep.subr.bf16.mxu1 %v1177_v2  ;;  %v1181_v5 = vld [vmem:[%s1601_s1 + $0x24] ss:$16 sps:$4 sm:$0xff]   ;;  %v1183_v6 = vld [vmem:[%s1601_s1 + $0x2c] ss:$16 sps:$4 sm:$0xff]  }
   0x3   :  { %263 = vmatpush1.bf16.msra.mxu0 %v1179_v3  ;;  %416 = vmatpush1.bf16.msra.mxu1 %v1180_v4  ;;  %v1185_v7 = vld [vmem:[%s1601_s1 + $0x20] ss:$16 sps:$4 sm:$0xff]   ;;  %v1186_v8 = vld [vmem:[%s1601_s1 + $0x28] ss:$16 sps:$4 sm:$0xff]   ;;  %v1187_v9 = vld [vmem:[%s1601_s1 + $0x44] ss:$16 sps:$4 sm:$0xff]  }
   0x4   :  { %264 = vmatprep.subr.bf16.mxu0 %v1181_v5  ;;  %417 = vmatprep.subr.bf16.mxu1 %v1183_v6  ;;  %v1189_v10 = vld [vmem:[%s1601_s1 + $0x4c] ss:$16 sps:$4 sm:$0xff]   ;;  %v1191_v11 = vld [vmem:[%s1601_s1 + $0x40] ss:$16 sps:$4 sm:$0xff]   ;;  %v1192_v12 = vld [vmem:[%s1601_s1 + $0x48] ss:$16 sps:$4 sm:$0xff]  }
   0x5   :  { %v1193_v13 = vld [vmem:[%s1601_s1 + $0x64] ss:$16 sps:$4 sm:$0xff]   ;;  %v1195_v14 = vld [vmem:[%s1601_s1 + $0x6c] ss:$16 sps:$4 sm:$0xff]   ;;  %v1197_v15 = vld [vmem:[%s1601_s1 + $0x60] ss:$16 sps:$4 sm:$0xff]  }
   0x6   :  { %v1198_v16 = vld [vmem:[%s1601_s1 + $0x68] ss:$16 sps:$4 sm:$0xff]   ;;  %v1199_v17 = vld [vmem:[%s1601_s1 + $0x84] ss:$16 sps:$4 sm:$0xff]   ;;  %v1201_v18 = vld [vmem:[%s1601_s1 + $0x8c] ss:$16 sps:$4 sm:$0xff]  }
   0x7   :  { %265 = vmatpush1.bf16.msra.mxu0 %v1185_v7  ;;  %418 = vmatpush1.bf16.msra.mxu1 %v1186_v8  ;;  %v1203_v19 = vld [vmem:[%s1601_s1 + $0x80] ss:$16 sps:$4 sm:$0xff]   ;;  %v1204_v20 = vld [vmem:[%s1601_s1 + $0x88] ss:$16 sps:$4 sm:$0xff]   ;;  %v619_v43 = vshrl.u32 %v618_v40, 7 }
   0x8   :  { %266 = vmatprep.subr.bf16.mxu0 %v1187_v9  ;;  %419 = vmatprep.subr.bf16.mxu1 %v1189_v10  ;;  %v1205_v21 = vld [vmem:[%s1602_s0] sm:$0xff]   ;;  %v1206_v22 = vld [vmem:[%s1602_s0 + $0x8] sm:$0xff]   ;;  %v1207_v23 = vld [vmem:[%s1602_s0 + $0x10] sm:$0xff]  }
   0x9   :  { %v1208_v24 = vld [vmem:[%s1602_s0 + $0x18] sm:$0xff]   ;;  %v1209_v25 = vld [vmem:[%s1602_s0 + $0x20] sm:$0xff]   ;;  %v1210_v26 = vld [vmem:[%s1602_s0 + $0x28] sm:$0xff]   ;;  %v620_v46 = vsub.s32 0, %v619_v43  ;;  %v624_v49 = vsub.s32 1, %v619_v43 }
   0xa   :  { %v1211_v27 = vld [vmem:[%s1602_s0 + $0x30] sm:$0xff]   ;;  %v1212_v28 = vld [vmem:[%s1602_s0 + $0x38] sm:$0xff]   ;;  %v1213_v29 = vld [vmem:[%s1602_s0 + $0x40] sm:$0xff]  }
   0xb   :  { %267 = vmatpush1.bf16.msra.mxu0 %v1191_v11  ;;  %420 = vmatpush1.bf16.msra.mxu1 %v1192_v12  ;;  %v1214_v30 = vld [vmem:[%s1602_s0 + $0x48] sm:$0xff]   ;;  %v1215_v31 = vld [vmem:[%s1602_s0 + $0x50] sm:$0xff]   ;;  %v1216_v32 = vld [vmem:[%s1602_s0 + $0x58] sm:$0xff]  }
   0xc   :  { %268 = vmatprep.subr.bf16.mxu0 %v1193_v13  ;;  %421 = vmatprep.subr.bf16.mxu1 %v1195_v14  ;;  %v779_v33 = vld [vmem:[%s1603_s4 + $0x8] sm:$0xff]  ;;  %v1217_v34 = vld [vmem:[%s1604_s2 + $0x40] sm:$0xff]   ;;  %v1221_v38 = vld [vmem:[%s1604_s2 + $0x50] sm:$0xff]  }
   0xd   :  { %v1218_v35 = vld [vmem:[%s1604_s2] sm:$0xff]   ;;  %v1219_v36 = vld [vmem:[%s1604_s2 + $0x48] sm:$0xff]   ;;  %v1222_v39 = vld [vmem:[%s1604_s2 + $0x10] sm:$0xff]  }
   0xe   :  { %v1220_v37 = vld [vmem:[%s1604_s2 + $0x8] sm:$0xff]   ;;  %v1223_v41 = vld [vmem:[%s1604_s2 + $0x58] sm:$0xff]   ;;  %v1225_v44 = vld [vmem:[%s1604_s2 + $0x60] sm:$0xff]  }
   0xf   :  { %269 = vmatpush1.bf16.msra.mxu0 %v1197_v15  ;;  %422 = vmatpush1.bf16.msra.mxu1 %v1198_v16  ;;  %v1224_v42 = vld [vmem:[%s1604_s2 + $0x18] sm:$0xff]   ;;  %v1226_v45 = vld [vmem:[%s1604_s2 + $0x20] sm:$0xff]   ;;  %v1227_v47 = vld [vmem:[%s1604_s2 + $0x68] sm:$0xff]  }
  0x10   :  { %270 = vmatprep.subr.bf16.mxu0 %v1199_v17  ;;  %423 = vmatprep.subr.bf16.mxu1 %v1201_v18  ;;  %v616_v48 = vld [vmem:[%s1605_s3] ss:$8 sm:$0x3]  ;;  %v1229_v52 = vld [vmem:[%s1604_s2 + $0x70] sm:$0xff]   ;;  %v1231_v3 = vld [vmem:[%s1604_s2 + $0x78] sm:$0xff]  }
  0x11   :  { %v1228_v50 = vld [vmem:[%s1604_s2 + $0x28] sm:$0xff]   ;;  %v1450_v51 = vrot.slane %v616_v48, %v620_v46  ;;  %v1455_v55 = vrot.slane %v616_v48, %v624_v49  ;;  %v1230_v62 = vld [vmem:[%s1604_s2 + $0x30] sm:$0xff]   ;;  %v1474_v10 = vld [vmem:[%s1605_s3 + $0x20] sm:$0xff] }
  0x12   :  { %v1469_v8 = vld [vmem:[%s1605_s3 + $0x10] sm:$0xff]  ;;  %v1232_v12 = vld [vmem:[%s1604_s2 + $0x38] sm:$0xff]   ;;  %v1488_v15 = vld [vmem:[%s1605_s3 + $0x28] sm:$0xff] }
  0x13   :  { %271 = vmatpush1.bf16.msra.mxu0 %v1203_v19  ;;  %424 = vmatpush1.bf16.msra.mxu1 %v1204_v20  ;;  %v1483_v13 = vld [vmem:[%s1605_s3 + $0x18] sm:$0xff] }
  0x14   :  { %1104 = vmatprep.subr.bf16.mxu1 %v1217_v34 }
  0x16   :  { %1063 = vmatmul.mubr.msk.bf16.vlgmr.msra.gmra.mrb[0].mxu0 %vm225_vm0, %v1205_v21  ;;  %1075 = vmatmul.mubr.msk.bf16.vlgmr.msra.gmra.mrb[0].mxu1 %vm225_vm0, %v1205_v21 }
  0x17   :  { %304 = vmatprep.mubr.bf16.mxu0 %v1233_v1  ;;  %457 = vmatprep.mubr.bf16.mxu1 %v1233_v1 }
  0x18   :  { %1105 = vmatpush3.bf16.msra.mxu1 %v1218_v35 }
  0x19   :  { %1106 = vmatprep.subr.bf16.mxu1 %v1219_v36 }
  0x1c   :  { %1107 = vmatpush3.bf16.msra.mxu1 %v1220_v37 }
  0x1d   :  { %1108 = vmatprep.subr.bf16.mxu1 %v1221_v38 }
  0x1e   :  { %1064 = vmatmul.mubr.msk.bf16.gmra.mrb[4].mxu0 %vm225_vm0, %v1206_v22  ;;  %1076 = vmatmul.mubr.msk.bf16.gmra.mrb[4].mxu1 %vm225_vm0, %v1206_v22 }
  0x1f   :  { %314 = vmatprep.mubr.bf16.mxu0 %v1233_v1  ;;  %467 = vmatprep.mubr.bf16.mxu1 %v1233_v1 }
  0x20   :  { %1109 = vmatpush3.bf16.msra.mxu1 %v1222_v39  ;;  %v1500_v39 = vld [vmem:[%s1605_s3 + $0x30] sm:$0xff] }
  0x21   :  { %1110 = vmatprep.subr.bf16.mxu1 %v1223_v41 }
  0x24   :  { %1111 = vmatpush3.bf16.msra.mxu1 %v1224_v42  ;;  %v1506_v42 = vld [vmem:[%s1605_s3 + $0x38] sm:$0xff] }
  0x25   :  { %1112 = vmatprep.subr.bf16.mxu1 %v1225_v44 }
  0x26   :  { %1065 = vmatmul.mubr.msk.bf16.gmra.mrb[8].mxu0 %vm225_vm0, %v1207_v23  ;;  %1077 = vmatmul.mubr.msk.bf16.gmra.mrb[8].mxu1 %vm225_vm0, %v1207_v23 }
  0x27   :  { %324 = vmatprep.mubr.bf16.mxu0 %v1233_v1  ;;  %477 = vmatprep.mubr.bf16.mxu1 %v1233_v1 }
  0x28   :  { %1113 = vmatpush3.bf16.msra.mxu1 %v1226_v45 }
  0x29   :  { %1114 = vmatprep.subr.bf16.mxu1 %v1227_v47 }
  0x2c   :  { %1115 = vmatpush3.bf16.msra.mxu1 %v1228_v50 }
  0x2d   :  { %1116 = vmatprep.subr.bf16.mxu1 %v1229_v52 }
  0x2e   :  { %1066 = vmatmul.mubr.msk.bf16.gmra.mrb[12].mxu0 %vm225_vm0, %v1208_v24  ;;  %1078 = vmatmul.mubr.msk.bf16.gmra.mrb[12].mxu1 %vm225_vm0, %v1208_v24 }
  0x2f   :  { %334 = vmatprep.mubr.bf16.mxu0 %v1233_v1  ;;  %487 = vmatprep.mubr.bf16.mxu1 %v1233_v1 }
  0x30   :  { %1117 = vmatpush3.bf16.msra.mxu1 %v1230_v62 }
  0x31   :  { %1118 = vmatprep.subr.bf16.mxu1 %v1231_v3 }
  0x34   :  { %1119 = vmatpush3.bf16.msra.mxu1 %v1232_v12 }
  0x36   :  { %1067 = vmatmul.mubr.msk.bf16.gmra.mrb[16].mxu0 %vm225_vm0, %v1209_v25  ;;  %1079 = vmatmul.mubr.msk.bf16.gmra.mrb[16].mxu1 %vm225_vm0, %v1209_v25 }
  0x37   :  { %344 = vmatprep.mubr.bf16.mxu0 %v1233_v1  ;;  %497 = vmatprep.mubr.bf16.mxu1 %v1233_v1 }
  0x3e   :  { %1068 = vmatmul.mubr.msk.bf16.gmra.mrb[20].mxu0 %vm225_vm0, %v1210_v26  ;;  %1080 = vmatmul.mubr.msk.bf16.gmra.mrb[20].mxu1 %vm225_vm0, %v1210_v26 }
  0x3f   :  { %354 = vmatprep.mubr.bf16.mxu0 %v1233_v1  ;;  %507 = vmatprep.mubr.bf16.mxu1 %v1233_v1 }
  0x46   :  { %1069 = vmatmul.mubr.msk.bf16.gmra.mrb[24].mxu0 %vm225_vm0, %v1211_v27  ;;  %1081 = vmatmul.mubr.msk.bf16.gmra.mrb[24].mxu1 %vm225_vm0, %v1211_v27 }
  0x47   :  { %364 = vmatprep.mubr.bf16.mxu0 %v1233_v1  ;;  %517 = vmatprep.mubr.bf16.mxu1 %v1233_v1 }
  0x4e   :  { %1070 = vmatmul.mubr.msk.bf16.gmra.mrb[28].mxu0 %vm225_vm0, %v1212_v28  ;;  %1082 = vmatmul.mubr.msk.bf16.gmra.mrb[28].mxu1 %vm225_vm0, %v1212_v28 }
  0x4f   :  { %374 = vmatprep.mubr.bf16.mxu0 %v1233_v1  ;;  %527 = vmatprep.mubr.bf16.mxu1 %v1233_v1 }
  0x56   :  { %1071 = vmatmul.mubr.msk.bf16.gmra.mrb[32].mxu0 %vm225_vm0, %v1213_v29  ;;  %1083 = vmatmul.mubr.msk.bf16.gmra.mrb[32].mxu1 %vm225_vm0, %v1213_v29 }
  0x57   :  { %384 = vmatprep.mubr.bf16.mxu0 %v1233_v1  ;;  %537 = vmatprep.mubr.bf16.mxu1 %v1233_v1 }
  0x5e   :  { %1072 = vmatmul.mubr.msk.bf16.gmra.mrb[36].mxu0 %vm225_vm0, %v1214_v30  ;;  %1084 = vmatmul.mubr.msk.bf16.gmra.mrb[36].mxu1 %vm225_vm0, %v1214_v30 }
  0x5f   :  { %394 = vmatprep.mubr.bf16.mxu0 %v1233_v1  ;;  %547 = vmatprep.mubr.bf16.mxu1 %v1233_v1 }
  0x66   :  { %1073 = vmatmul.mubr.msk.bf16.gmra.mrb[40].mxu0 %vm225_vm0, %v1215_v31  ;;  %1085 = vmatmul.mubr.msk.bf16.gmra.mrb[40].mxu1 %vm225_vm0, %v1215_v31 }
  0x67   :  { %404 = vmatprep.mubr.bf16.mxu0 %v1233_v1  ;;  %557 = vmatprep.mubr.bf16.mxu1 %v1233_v1 }
  0x6e   :  { %1074 = vmatmul.mubr.msk.bf16.gmra.mrb[44].mxu0 %vm225_vm0, %v1216_v32  ;;  %1086 = vmatmul.mubr.msk.bf16.gmra.mrb[44].mxu1 %vm225_vm0, %v1216_v32 }
  0x6f   :  { %1087 = vmatprep.mubr.msk.f32.mxu0 %vm780_vm1, %v779_v33 }
  0xe9   :  { %v296_v53 = vpop.f32.mrb[0].mxu0  ;;  %v449_v54 = vpop.f32.mrb[0].mxu1 }
  0xea   :  { %v568_v56 = vmax.f32 %v296_v53, %v449_v54  ;;  %v298_v57 = vpop.f32.mrb[1].mxu0  ;;  %v451_v58 = vpop.f32.mrb[1].mxu1 }
  0xeb   :  { %v569_v59 = vmax.f32 %v298_v57, %v451_v58  ;;  %v300_v60 = vpop.f32.mrb[2].mxu0  ;;  %v453_v61 = vpop.f32.mrb[2].mxu1 }
  0xec   :  { %v628_v63 = vadd.f32 %v1450_v51, %v568_v56  ;;  %v570_v0 = vmax.f32 %v300_v60, %v453_v61  ;;  %v302_v1 = vpop.f32.mrb[3].mxu0  ;;  %v455_v2 = vpop.f32.mrb[3].mxu1 }
  0xed   :  { %v629_v4 = vadd.f32 %v1455_v55, %v569_v59  ;;  %v571_v5 = vmax.f32 %v302_v1, %v455_v2 }
  0xee   :  { %v676_v6 = vmax.f32 %v628_v63, 0.0  ;;  %v630_v7 = vadd.f32 %v1450_v51, %v570_v0 }
  0xef   :  { %v677_v9 = vmax.f32 %v629_v4, 0.0  ;;  %v631_v11 = vadd.f32 %v1455_v55, %v571_v5 }
  0xf0   :  { %v678_v14 = vmax.f32 %v630_v7, 0.0  ;;  %v730_v19 = vmul.f32 %v1469_v8, %v676_v6 }
  0xf1   :  { %v679_v16 = vmax.f32 %v631_v11, 0.0  ;;  %v306_v17 = vpop.f32.mrb[4].mxu0  ;;  %v459_v18 = vpop.f32.mrb[4].mxu1  ;;  %v731_v24 = vmul.f32 %v1483_v13, %v677_v9 }
  0xf2   :  { %v732_v20 = vmul.f32 %v1474_v10, %v678_v14  ;;  %v572_v21 = vmax.f32 %v306_v17, %v459_v18  ;;  %v308_v22 = vpop.f32.mrb[5].mxu0  ;;  %v461_v23 = vpop.f32.mrb[5].mxu1 }
  0xf3   :  { %v733_v25 = vmul.f32 %v1488_v15, %v679_v16  ;;  %v573_v26 = vmax.f32 %v308_v22, %v461_v23  ;;  %v310_v27 = vpop.f32.mrb[6].mxu0  ;;  %v463_v28 = vpop.f32.mrb[6].mxu1 }
  0xf4   :  { %v1128_v29 = vpack.c.bf16 %v732_v20, %v730_v19  ;;  %v632_v30 = vadd.f32 %v1450_v51, %v572_v21  ;;  %v574_v31 = vmax.f32 %v310_v27, %v463_v28  ;;  %v312_v32 = vpop.f32.mrb[7].mxu0  ;;  %v465_v33 = vpop.f32.mrb[7].mxu1 }
  0xf5   :  { %v633_v34 = vadd.f32 %v1455_v55, %v573_v26  ;;  %v575_v35 = vmax.f32 %v312_v32, %v465_v33  ;;  %v1126_v36 = vpack.c.bf16 %v733_v25, %v731_v24 }
  0xf6   :  { %v680_v37 = vmax.f32 %v632_v30, 0.0  ;;  %v634_v38 = vadd.f32 %v1450_v51, %v574_v31 }
  0xf7   :  { %v681_v40 = vmax.f32 %v633_v34, 0.0  ;;  %v635_v41 = vadd.f32 %v1455_v55, %v575_v35  ;;  %1127 = vmatprep.subr.bf16.mxu0 %v1126_v36 }
  0xf8   :  { %v682_v43 = vmax.f32 %v634_v38, 0.0  ;;  %1129 = vmatpush1.bf16.msra.mxu0 %v1128_v29  ;;  %v734_v47 = vmul.f32 %v1500_v39, %v680_v37 }
  0xf9   :  { %v683_v44 = vmax.f32 %v635_v41, 0.0  ;;  %v316_v45 = vpop.f32.mrb[8].mxu0  ;;  %v469_v46 = vpop.f32.mrb[8].mxu1  ;;  %v735_v53 = vmul.f32 %v1506_v42, %v681_v40 }
  0xfa   :  { %v736_v48 = vmul.f32 %v1469_v8, %v682_v43  ;;  %v576_v49 = vmax.f32 %v316_v45, %v469_v46  ;;  %v318_v50 = vpop.f32.mrb[9].mxu0  ;;  %v471_v52 = vpop.f32.mrb[9].mxu1 }
  0xfb   :  { %v737_v54 = vmul.f32 %v1483_v13, %v683_v44  ;;  %v577_v56 = vmax.f32 %v318_v50, %v471_v52  ;;  %v320_v57 = vpop.f32.mrb[10].mxu0  ;;  %v473_v58 = vpop.f32.mrb[10].mxu1 }
  0xfc   :  { %v1132_v59 = vpack.c.bf16 %v736_v48, %v734_v47  ;;  %v636_v60 = vadd.f32 %v1450_v51, %v576_v49  ;;  %v578_v61 = vmax.f32 %v320_v57, %v473_v58  ;;  %v322_v62 = vpop.f32.mrb[11].mxu0  ;;  %v475_v63 = vpop.f32.mrb[11].mxu1 }
  0xfd   :  { %v637_v0 = vadd.f32 %v1455_v55, %v577_v56  ;;  %v579_v1 = vmax.f32 %v322_v62, %v475_v63  ;;  %v1130_v2 = vpack.c.bf16 %v737_v54, %v735_v53 }
  0xfe   :  { %v684_v3 = vmax.f32 %v636_v60, 0.0  ;;  %v638_v4 = vadd.f32 %v1450_v51, %v578_v61 }
  0xff   :  { %v685_v5 = vmax.f32 %v637_v0, 0.0  ;;  %v639_v6 = vadd.f32 %v1455_v55, %v579_v1  ;;  %1131 = vmatprep.subr.bf16.mxu0 %v1130_v2 }
 0x100   :  { %v686_v7 = vmax.f32 %v638_v4, 0.0  ;;  %1133 = vmatpush1.bf16.msra.mxu0 %v1132_v59  ;;  %v738_v14 = vmul.f32 %v1474_v10, %v684_v3 }
 0x101   :  { %v687_v9 = vmax.f32 %v639_v6, 0.0  ;;  %v326_v11 = vpop.f32.mrb[12].mxu0  ;;  %v479_v12 = vpop.f32.mrb[12].mxu1  ;;  %v739_v20 = vmul.f32 %v1488_v15, %v685_v5 }
 0x102   :  { %v740_v16 = vmul.f32 %v1500_v39, %v686_v7  ;;  %v580_v17 = vmax.f32 %v326_v11, %v479_v12  ;;  %v328_v18 = vpop.f32.mrb[13].mxu0  ;;  %v481_v19 = vpop.f32.mrb[13].mxu1 }
 0x103   :  { %v741_v21 = vmul.f32 %v1506_v42, %v687_v9  ;;  %v581_v22 = vmax.f32 %v328_v18, %v481_v19  ;;  %v330_v23 = vpop.f32.mrb[14].mxu0  ;;  %v483_v24 = vpop.f32.mrb[14].mxu1 }
 0x104   :  { %v1136_v25 = vpack.c.bf16 %v740_v16, %v738_v14  ;;  %v640_v26 = vadd.f32 %v1450_v51, %v580_v17  ;;  %v582_v27 = vmax.f32 %v330_v23, %v483_v24  ;;  %v332_v28 = vpop.f32.mrb[15].mxu0  ;;  %v485_v29 = vpop.f32.mrb[15].mxu1 }
 0x105   :  { %v641_v30 = vadd.f32 %v1455_v55, %v581_v22  ;;  %v583_v31 = vmax.f32 %v332_v28, %v485_v29  ;;  %v1134_v32 = vpack.c.bf16 %v741_v21, %v739_v20 }
 0x106   :  { %v688_v33 = vmax.f32 %v640_v26, 0.0  ;;  %v642_v34 = vadd.f32 %v1450_v51, %v582_v27 }
 0x107   :  { %v689_v35 = vmax.f32 %v641_v30, 0.0  ;;  %v643_v36 = vadd.f32 %v1455_v55, %v583_v31  ;;  %1135 = vmatprep.subr.bf16.mxu0 %v1134_v32 }
 0x108   :  { %v690_v37 = vmax.f32 %v642_v34, 0.0  ;;  %1137 = vmatpush1.bf16.msra.mxu0 %v1136_v25  ;;  %v742_v43 = vmul.f32 %v1469_v8, %v688_v33 }
 0x109   :  { %v691_v38 = vmax.f32 %v643_v36, 0.0  ;;  %v336_v40 = vpop.f32.mrb[16].mxu0  ;;  %v489_v41 = vpop.f32.mrb[16].mxu1  ;;  %v743_v48 = vmul.f32 %v1483_v13, %v689_v35 }
 0x10a   :  { %v744_v44 = vmul.f32 %v1474_v10, %v690_v37  ;;  %v584_v45 = vmax.f32 %v336_v40, %v489_v41  ;;  %v338_v46 = vpop.f32.mrb[17].mxu0  ;;  %v491_v47 = vpop.f32.mrb[17].mxu1 }
 0x10b   :  { %v745_v49 = vmul.f32 %v1488_v15, %v691_v38  ;;  %v585_v50 = vmax.f32 %v338_v46, %v491_v47  ;;  %v340_v52 = vpop.f32.mrb[18].mxu0  ;;  %v493_v53 = vpop.f32.mrb[18].mxu1 }
 0x10c   :  { %v1140_v54 = vpack.c.bf16 %v744_v44, %v742_v43  ;;  %v644_v56 = vadd.f32 %v1450_v51, %v584_v45  ;;  %v586_v57 = vmax.f32 %v340_v52, %v493_v53  ;;  %v342_v58 = vpop.f32.mrb[19].mxu0  ;;  %v495_v59 = vpop.f32.mrb[19].mxu1 }
 0x10d   :  { %v645_v60 = vadd.f32 %v1455_v55, %v585_v50  ;;  %v587_v61 = vmax.f32 %v342_v58, %v495_v59  ;;  %v1138_v62 = vpack.c.bf16 %v745_v49, %v743_v48 }
 0x10e   :  { %v692_v63 = vmax.f32 %v644_v56, 0.0  ;;  %v646_v0 = vadd.f32 %v1450_v51, %v586_v57 }
 0x10f   :  { %v693_v1 = vmax.f32 %v645_v60, 0.0  ;;  %v647_v2 = vadd.f32 %v1455_v55, %v587_v61  ;;  %1139 = vmatprep.subr.bf16.mxu0 %v1138_v62 }
 0x110   :  { %v694_v3 = vmax.f32 %v646_v0, 0.0  ;;  %1141 = vmatpush1.bf16.msra.mxu0 %v1140_v54  ;;  %v746_v7 = vmul.f32 %v1500_v39, %v692_v63 }
 0x111   :  { %v695_v4 = vmax.f32 %v647_v2, 0.0  ;;  %v346_v5 = vpop.f32.mrb[20].mxu0  ;;  %v499_v6 = vpop.f32.mrb[20].mxu1  ;;  %v747_v16 = vmul.f32 %v1506_v42, %v693_v1 }
 0x112   :  { %v748_v9 = vmul.f32 %v1469_v8, %v694_v3  ;;  %v588_v11 = vmax.f32 %v346_v5, %v499_v6  ;;  %v348_v12 = vpop.f32.mrb[21].mxu0  ;;  %v501_v14 = vpop.f32.mrb[21].mxu1 }
 0x113   :  { %v749_v17 = vmul.f32 %v1483_v13, %v695_v4  ;;  %v589_v18 = vmax.f32 %v348_v12, %v501_v14  ;;  %v350_v19 = vpop.f32.mrb[22].mxu0  ;;  %v503_v20 = vpop.f32.mrb[22].mxu1 }
 0x114   :  { %v1144_v21 = vpack.c.bf16 %v748_v9, %v746_v7  ;;  %v648_v22 = vadd.f32 %v1450_v51, %v588_v11  ;;  %v590_v23 = vmax.f32 %v350_v19, %v503_v20  ;;  %v352_v24 = vpop.f32.mrb[23].mxu0  ;;  %v505_v25 = vpop.f32.mrb[23].mxu1 }
 0x115   :  { %v649_v26 = vadd.f32 %v1455_v55, %v589_v18  ;;  %v591_v27 = vmax.f32 %v352_v24, %v505_v25  ;;  %v1142_v28 = vpack.c.bf16 %v749_v17, %v747_v16 }
 0x116   :  { %v696_v29 = vmax.f32 %v648_v22, 0.0  ;;  %v650_v30 = vadd.f32 %v1450_v51, %v590_v23 }
 0x117   :  { %v697_v31 = vmax.f32 %v649_v26, 0.0  ;;  %v651_v32 = vadd.f32 %v1455_v55, %v591_v27  ;;  %1143 = vmatprep.subr.bf16.mxu0 %v1142_v28 }
 0x118   :  { %v698_v33 = vmax.f32 %v650_v30, 0.0  ;;  %1145 = vmatpush1.bf16.msra.mxu0 %v1144_v21  ;;  %v750_v37 = vmul.f32 %v1474_v10, %v696_v29 }
 0x119   :  { %v699_v34 = vmax.f32 %v651_v32, 0.0  ;;  %v356_v35 = vpop.f32.mrb[24].mxu0  ;;  %v509_v36 = vpop.f32.mrb[24].mxu1  ;;  %v751_v44 = vmul.f32 %v1488_v15, %v697_v31 }
 0x11a   :  { %v752_v38 = vmul.f32 %v1500_v39, %v698_v33  ;;  %v592_v40 = vmax.f32 %v356_v35, %v509_v36  ;;  %v358_v41 = vpop.f32.mrb[25].mxu0  ;;  %v511_v43 = vpop.f32.mrb[25].mxu1 }
 0x11b   :  { %v753_v45 = vmul.f32 %v1506_v42, %v699_v34  ;;  %v593_v46 = vmax.f32 %v358_v41, %v511_v43  ;;  %v360_v47 = vpop.f32.mrb[26].mxu0  ;;  %v513_v48 = vpop.f32.mrb[26].mxu1 }
 0x11c   :  { %v1148_v49 = vpack.c.bf16 %v752_v38, %v750_v37  ;;  %v652_v50 = vadd.f32 %v1450_v51, %v592_v40  ;;  %v594_v52 = vmax.f32 %v360_v47, %v513_v48  ;;  %v362_v53 = vpop.f32.mrb[27].mxu0  ;;  %v515_v54 = vpop.f32.mrb[27].mxu1 }
 0x11d   :  { %v653_v56 = vadd.f32 %v1455_v55, %v593_v46  ;;  %v595_v57 = vmax.f32 %v362_v53, %v515_v54  ;;  %v1146_v58 = vpack.c.bf16 %v753_v45, %v751_v44 }
 0x11e   :  { %v700_v59 = vmax.f32 %v652_v50, 0.0  ;;  %v654_v60 = vadd.f32 %v1450_v51, %v594_v52 }
 0x11f   :  { %v701_v61 = vmax.f32 %v653_v56, 0.0  ;;  %v655_v62 = vadd.f32 %v1455_v55, %v595_v57  ;;  %1147 = vmatprep.subr.bf16.mxu0 %v1146_v58 }
 0x120   :  { %v702_v63 = vmax.f32 %v654_v60, 0.0  ;;  %1149 = vmatpush1.bf16.msra.mxu0 %v1148_v49  ;;  %v754_v3 = vmul.f32 %v1469_v8, %v700_v59 }
 0x121   :  { %v703_v0 = vmax.f32 %v655_v62, 0.0  ;;  %v366_v1 = vpop.f32.mrb[28].mxu0  ;;  %v519_v2 = vpop.f32.mrb[28].mxu1  ;;  %v755_v9 = vmul.f32 %v1483_v13, %v701_v61 }
 0x122   :  { %v756_v4 = vmul.f32 %v1474_v10, %v702_v63  ;;  %v596_v5 = vmax.f32 %v366_v1, %v519_v2  ;;  %v368_v6 = vpop.f32.mrb[29].mxu0  ;;  %v521_v7 = vpop.f32.mrb[29].mxu1 }
 0x123   :  { %v757_v11 = vmul.f32 %v1488_v15, %v703_v0  ;;  %v597_v12 = vmax.f32 %v368_v6, %v521_v7  ;;  %v370_v14 = vpop.f32.mrb[30].mxu0  ;;  %v523_v16 = vpop.f32.mrb[30].mxu1 }
 0x124   :  { %v1152_v17 = vpack.c.bf16 %v756_v4, %v754_v3  ;;  %v656_v18 = vadd.f32 %v1450_v51, %v596_v5  ;;  %v598_v19 = vmax.f32 %v370_v14, %v523_v16  ;;  %v372_v20 = vpop.f32.mrb[31].mxu0  ;;  %v525_v21 = vpop.f32.mrb[31].mxu1 }
 0x125   :  { %v657_v22 = vadd.f32 %v1455_v55, %v597_v12  ;;  %v599_v23 = vmax.f32 %v372_v20, %v525_v21  ;;  %v1150_v24 = vpack.c.bf16 %v757_v11, %v755_v9 }
 0x126   :  { %v704_v25 = vmax.f32 %v656_v18, 0.0  ;;  %v658_v26 = vadd.f32 %v1450_v51, %v598_v19 }
 0x127   :  { %v705_v27 = vmax.f32 %v657_v22, 0.0  ;;  %v659_v28 = vadd.f32 %v1455_v55, %v599_v23  ;;  %1151 = vmatprep.subr.bf16.mxu0 %v1150_v24 }
 0x128   :  { %v706_v29 = vmax.f32 %v658_v26, 0.0  ;;  %1153 = vmatpush1.bf16.msra.mxu0 %v1152_v17  ;;  %v758_v33 = vmul.f32 %v1500_v39, %v704_v25 }
 0x129   :  { %v707_v30 = vmax.f32 %v659_v28, 0.0  ;;  %v376_v31 = vpop.f32.mrb[32].mxu0  ;;  %v529_v32 = vpop.f32.mrb[32].mxu1  ;;  %v759_v38 = vmul.f32 %v1506_v42, %v705_v27 }
 0x12a   :  { %v760_v34 = vmul.f32 %v1469_v8, %v706_v29  ;;  %v600_v35 = vmax.f32 %v376_v31, %v529_v32  ;;  %v378_v36 = vpop.f32.mrb[33].mxu0  ;;  %v531_v37 = vpop.f32.mrb[33].mxu1 }
 0x12b   :  { %v761_v40 = vmul.f32 %v1483_v13, %v707_v30  ;;  %v601_v41 = vmax.f32 %v378_v36, %v531_v37  ;;  %v380_v43 = vpop.f32.mrb[34].mxu0  ;;  %v533_v44 = vpop.f32.mrb[34].mxu1 }
 0x12c   :  { %v1156_v45 = vpack.c.bf16 %v760_v34, %v758_v33  ;;  %v660_v46 = vadd.f32 %v1450_v51, %v600_v35  ;;  %v602_v47 = vmax.f32 %v380_v43, %v533_v44  ;;  %v382_v48 = vpop.f32.mrb[35].mxu0  ;;  %v535_v49 = vpop.f32.mrb[35].mxu1 }
 0x12d   :  { %v661_v50 = vadd.f32 %v1455_v55, %v601_v41  ;;  %v603_v52 = vmax.f32 %v382_v48, %v535_v49  ;;  %v1154_v53 = vpack.c.bf16 %v761_v40, %v759_v38 }
 0x12e   :  { %v708_v54 = vmax.f32 %v660_v46, 0.0  ;;  %v662_v56 = vadd.f32 %v1450_v51, %v602_v47 }
 0x12f   :  { %v709_v57 = vmax.f32 %v661_v50, 0.0  ;;  %v663_v58 = vadd.f32 %v1455_v55, %v603_v52  ;;  %1155 = vmatprep.subr.bf16.mxu0 %v1154_v53 }
 0x130   :  { %v710_v59 = vmax.f32 %v662_v56, 0.0  ;;  %1157 = vmatpush1.bf16.msra.mxu0 %v1156_v45  ;;  %v762_v63 = vmul.f32 %v1474_v10, %v708_v54 }
 0x131   :  { %v711_v60 = vmax.f32 %v663_v58, 0.0  ;;  %v386_v61 = vpop.f32.mrb[36].mxu0  ;;  %v539_v62 = vpop.f32.mrb[36].mxu1  ;;  %v763_v4 = vmul.f32 %v1488_v15, %v709_v57 }
 0x132   :  { %v764_v0 = vmul.f32 %v1500_v39, %v710_v59  ;;  %v604_v1 = vmax.f32 %v386_v61, %v539_v62  ;;  %v388_v2 = vpop.f32.mrb[37].mxu0  ;;  %v541_v3 = vpop.f32.mrb[37].mxu1 }
 0x133   :  { %v765_v5 = vmul.f32 %v1506_v42, %v711_v60  ;;  %v605_v6 = vmax.f32 %v388_v2, %v541_v3  ;;  %v390_v7 = vpop.f32.mrb[38].mxu0  ;;  %v543_v9 = vpop.f32.mrb[38].mxu1 }
 0x134   :  { %v1160_v11 = vpack.c.bf16 %v764_v0, %v762_v63  ;;  %v664_v12 = vadd.f32 %v1450_v51, %v604_v1  ;;  %v606_v14 = vmax.f32 %v390_v7, %v543_v9  ;;  %v392_v16 = vpop.f32.mrb[39].mxu0  ;;  %v545_v17 = vpop.f32.mrb[39].mxu1 }
 0x135   :  { %v665_v18 = vadd.f32 %v1455_v55, %v605_v6  ;;  %v607_v19 = vmax.f32 %v392_v16, %v545_v17  ;;  %v1158_v20 = vpack.c.bf16 %v765_v5, %v763_v4 }
 0x136   :  { %v712_v21 = vmax.f32 %v664_v12, 0.0  ;;  %v666_v22 = vadd.f32 %v1450_v51, %v606_v14 }
 0x137   :  { %v713_v23 = vmax.f32 %v665_v18, 0.0  ;;  %v667_v24 = vadd.f32 %v1455_v55, %v607_v19  ;;  %1159 = vmatprep.subr.bf16.mxu0 %v1158_v20 }
 0x138   :  { %v714_v25 = vmax.f32 %v666_v22, 0.0  ;;  %1161 = vmatpush1.bf16.msra.mxu0 %v1160_v11  ;;  %v766_v29 = vmul.f32 %v1469_v8, %v712_v21 }
 0x139   :  { %v715_v26 = vmax.f32 %v667_v24, 0.0  ;;  %v396_v27 = vpop.f32.mrb[40].mxu0  ;;  %v549_v28 = vpop.f32.mrb[40].mxu1  ;;  %v767_v34 = vmul.f32 %v1483_v13, %v713_v23 }
 0x13a   :  { %v768_v30 = vmul.f32 %v1474_v10, %v714_v25  ;;  %v608_v31 = vmax.f32 %v396_v27, %v549_v28  ;;  %v398_v32 = vpop.f32.mrb[41].mxu0  ;;  %v551_v33 = vpop.f32.mrb[41].mxu1 }
 0x13b   :  { %v769_v35 = vmul.f32 %v1488_v15, %v715_v26  ;;  %v609_v36 = vmax.f32 %v398_v32, %v551_v33  ;;  %v400_v37 = vpop.f32.mrb[42].mxu0  ;;  %v553_v38 = vpop.f32.mrb[42].mxu1 }
 0x13c   :  { %v1164_v40 = vpack.c.bf16 %v768_v30, %v766_v29  ;;  %v668_v41 = vadd.f32 %v1450_v51, %v608_v31  ;;  %v610_v43 = vmax.f32 %v400_v37, %v553_v38  ;;  %v402_v44 = vpop.f32.mrb[43].mxu0  ;;  %v555_v45 = vpop.f32.mrb[43].mxu1 }
 0x13d   :  { %v669_v46 = vadd.f32 %v1455_v55, %v609_v36  ;;  %v611_v47 = vmax.f32 %v402_v44, %v555_v45  ;;  %v1162_v48 = vpack.c.bf16 %v769_v35, %v767_v34 }
 0x13e   :  { %v716_v49 = vmax.f32 %v668_v41, 0.0  ;;  %v670_v50 = vadd.f32 %v1450_v51, %v610_v43 }
 0x13f   :  { %v717_v52 = vmax.f32 %v669_v46, 0.0  ;;  %v671_v53 = vadd.f32 %v1455_v55, %v611_v47  ;;  %1163 = vmatprep.subr.bf16.mxu0 %v1162_v48 }
 0x140   :  { %v718_v54 = vmax.f32 %v670_v50, 0.0  ;;  %1165 = vmatpush1.bf16.msra.mxu0 %v1164_v40  ;;  %v770_v59 = vmul.f32 %v1500_v39, %v716_v49 }
 0x141   :  { %v719_v56 = vmax.f32 %v671_v53, 0.0  ;;  %v406_v57 = vpop.f32.mrb[44].mxu0  ;;  %v559_v58 = vpop.f32.mrb[44].mxu1  ;;  %v771_v0 = vmul.f32 %v1506_v42, %v717_v52 }
 0x142   :  { %v772_v60 = vmul.f32 %v1469_v8, %v718_v54  ;;  %v612_v61 = vmax.f32 %v406_v57, %v559_v58  ;;  %v408_v62 = vpop.f32.mrb[45].mxu0  ;;  %v561_v63 = vpop.f32.mrb[45].mxu1 }
 0x143   :  { %v773_v1 = vmul.f32 %v1483_v13, %v719_v56  ;;  %v613_v2 = vmax.f32 %v408_v62, %v561_v63  ;;  %v410_v3 = vpop.f32.mrb[46].mxu0  ;;  %v563_v4 = vpop.f32.mrb[46].mxu1 }
 0x144   :  { %v1168_v5 = vpack.c.bf16 %v772_v60, %v770_v59  ;;  %v672_v6 = vadd.f32 %v1450_v51, %v612_v61  ;;  %v614_v7 = vmax.f32 %v410_v3, %v563_v4  ;;  %v412_v9 = vpop.f32.mrb[47].mxu0  ;;  %v565_v11 = vpop.f32.mrb[47].mxu1 }
 0x145   :  { %v673_v12 = vadd.f32 %v1455_v55, %v613_v2  ;;  %v615_v14 = vmax.f32 %v412_v9, %v565_v11  ;;  %v1166_v8 = vpack.c.bf16 %v773_v1, %v771_v0 }
 0x146   :  { %v720_v16 = vmax.f32 %v672_v6, 0.0  ;;  %v674_v17 = vadd.f32 %v1450_v51, %v614_v7  ;;  %v778_v51 = vld [vmem:[%s1603_s4] sm:$0xff] }
 0x147   :  { %v721_v18 = vmax.f32 %v673_v12, 0.0  ;;  %v675_v19 = vadd.f32 %v1455_v55, %v615_v14  ;;  %1167 = vmatprep.subr.bf16.mxu0 %v1166_v8 }
 0x148   :  { %v722_v13 = vmax.f32 %v674_v17, 0.0  ;;  %1169 = vmatpush1.bf16.msra.mxu0 %v1168_v5  ;;  %v774_v21 = vmul.f32 %v1474_v10, %v720_v16 }
 0x149   :  { %v723_v20 = vmax.f32 %v675_v19, 0.0  ;;  %v775_v23 = vmul.f32 %v1488_v15, %v721_v18  ;;  %v889_v15 = vld [vmem:[%s1605_s3 + $0x1] ss:$0 sm:$0xff] }
 0x14a   :  { %v776_v22 = vmul.f32 %v1500_v39, %v722_v13 }
 0x14b   :  { %v777_v24 = vmul.f32 %v1506_v42, %v723_v20 }
 0x14c   :  { %v1172_v25 = vpack.c.bf16 %v776_v22, %v774_v21 }
 0x14d   :  { %v1170_v26 = vpack.c.bf16 %v777_v24, %v775_v23 }
 0x14f   :  { %1171 = vmatprep.subr.bf16.mxu0 %v1170_v26 }
 0x150   :  { %1173 = vmatpush1.bf16.msra.mxu0 %v1172_v25 }
 0x153   :  { %849 = vmatmul.mubr.f32.vlgmr.msra.gmra.mrb[48].mxu0 %v778_v51 }
 0x226   :  { %v850_v55 = vpop.f32.mrb[48].mxu0 }
 0x227   :  { %v852_v27 = vpop.f32.mrb[49].mxu0  ;;  %v855_v29 = vpack.c.bf16 %v850_v55, %v850_v55 }
 0x228   :  { %v856_v28 = vpack.c.bf16 %v852_v27, %v852_v27 }
 0x22a   :  { %1018 = vmatprep.mubr.bf16.mxu1 %v856_v28 }
 0x22b   :  { %1019 = vmatmul.mubr.bf16.vlgmr.msra.gmra.mrb[48].mxu1 %v855_v29 }
 0x2fe   :  { %v1120_v10 = vpop.f32.mrb[48].mxu1 }
 0x2ff   :  { %v1121_v39 = vpop.f32.mrb[49].mxu1 }
 0x300   :  { %v1122_v42 = vadd.f32 %v1121_v39, %v1120_v10  ;;  %v1123_v30 = vpop.f32.mrb[50].mxu1 }
 0x301   :  { %v1124_v31 = vpop.f32.mrb[51].mxu1 }
 0x302   :  { %v1021_v32 = vadd.f32 %v1122_v42, %v889_v15 }
 0x304   :  { %1026 = vst [vmem:[%s1606_s5] sm:$0xff] %v1021_v32 }

</bundles_post_ra>
